<compile_context>
chip_gen: v5e
topology: v5e:2x2
jax: 0.10.0
libtpu: 0.0.40
codegen_flags: <defaults>
</compile_context>

<pallas_src>
import functools
import math

import jax
import jax.numpy as jnp
from jax import lax
from jax.experimental import pallas as pl
from jax.experimental.pallas import tpu as pltpu


def _contrastive_loss_kernel(q_ref, k_ref, loss_ref, *,
                             temperature: float, tile_m: int):
    # q_ref: [tile_m, D] row tile of features; k_ref: [B, D] full features
    # (resident across the grid); loss_ref: [tile_m, 1] per-row loss output.
    inv_sqrt_t = 1.0 / math.sqrt(temperature)

    # Keep all elementwise / EUP math in f32 (v5e has no bf16 VPU/EUP path).
    q = q_ref[...].astype(jnp.float32)                        # [tm, D]
    k = k_ref[...].astype(jnp.float32)                        # [B,  D]

    # F.normalize(x, dim=-1) == x * rsqrt(max(||x||^2, 1e-24)); fold the
    # similarity 1/temperature into the same multiply (1/sqrt(T) per operand).
    q_inv = lax.rsqrt(jnp.maximum(jnp.sum(q * q, axis=-1, keepdims=True),
                                  1e-24)) * inv_sqrt_t        # [tm, 1]
    k_inv = lax.rsqrt(jnp.maximum(jnp.sum(k * k, axis=-1, keepdims=True),
                                  1e-24)) * inv_sqrt_t        # [B, 1]
    qs = q * q_inv                                            # [tm, D]
    ks = k * k_inv                                            # [B,  D]

    # sim = (q_n @ k_n.T) / T as one MXU matmul, NT form (contract dim 1 with
    # dim 1, no XLU transpose), bf16 operands, f32 accumulation.
    sim = lax.dot_general(
        qs.astype(jnp.bfloat16), ks.astype(jnp.bfloat16),
        dimension_numbers=(((1,), (1,)), ((), ())),
        preferred_element_type=jnp.float32)                   # [tm, B]

    tm, b_full = sim.shape
    row_off = pl.program_id(0) * tile_m
    rows = row_off + lax.broadcasted_iota(jnp.int32, (tm, b_full), 0)
    cols = lax.broadcasted_iota(jnp.int32, (tm, b_full), 1)
    on_diag = rows == cols                                    # eye(B) row slab

    # Reference: exp_sim = exp(sim).masked_fill(eye, 0); row sum.
    # exp + mask + reduce fused — exp(sim) is never a separate live [B,B].
    # NOTE: no max-subtraction/clamp (reference has none); sim is bounded by
    # 1/temperature, fine for any realistic T, and pos_sim==0 makes the final
    # value +inf regardless.
    neg_sim = jnp.sum(jnp.where(on_diag, 0.0, jnp.exp(sim)),
                      axis=-1, keepdims=True)                 # [tm, 1]

    # Reference bug preserved: diagonal zeroed *before* torch.diag, so
    # pos_sim == 0 exactly and the loss is +inf per row.
    # (Intended-semantics variant would be: diag_sim = q_sumsq*q_inv*q_inv
    #  (~= 1/T, from the f32 path), loss = log(exp(diag_sim)+neg+eps)-diag_sim.)
    pos_sim = jnp.zeros_like(neg_sim)                         # [tm, 1]

    # -log(pos / (pos + neg + 1e-8)) == log(pos + neg + 1e-8) - log(pos);
    # both logs go to the EUP, no vector divide. log(0) -> -inf -> loss +inf,
    # exactly like the PyTorch reference.
    loss_ref[...] = jnp.log(pos_sim + neg_sim + 1e-8) - jnp.log(pos_sim)


def _pick_tile_m(batch: int) -> int:
    if batch <= 256:
        return batch                      # single tile, block == full array
    for t in (256, 128, 64, 32, 16, 8):   # 256-aligned fills v6e/v7x MXU
        if batch % t == 0:
            return t
    return batch                          # odd batch: fall back to one block


def _vmem_limit_bytes(batch: int, dim: int, tile_m: int):
    # Rough working-set estimate: double-buffered q tile, resident features,
    # bf16 copies, sim slab + fused exp/mask temporaries, plus slack.
    est = 4 * (2 * tile_m * dim + 4 * batch * dim + 4 * tile_m * batch)
    est += 1 << 20
    if est <= 16 * 1024 * 1024:           # fits every generation's default
        return None
    return min(int(est), 96 * 1024 * 1024)


def contrastive_loss(features: jax.Array,
                     labels: jax.Array,
                     temperature: float = 0.1) -> jax.Array:
    """Pallas implementation of ContrastiveLoss.forward (labels are unused,
    exactly as in the PyTorch reference)."""
    del labels  # unused by the reference forward pass
    batch, dim = features.shape
    tile_m = _pick_tile_m(batch)
    grid = (batch // tile_m,)

    kernel = functools.partial(_contrastive_loss_kernel,
                               temperature=float(temperature),
                               tile_m=tile_m)

    per_row = pl.pallas_call(
        kernel,
        out_shape=jax.ShapeDtypeStruct((batch, 1), jnp.float32),
        grid_spec=pltpu.PrefetchScalarGridSpec(
            num_scalar_prefetch=0,
            grid=grid,
            in_specs=[
                # Row tile of queries.
                pl.BlockSpec((tile_m, dim), lambda i: (i, 0)),
                # Full feature matrix as keys, resident across the grid
                # (constant block index -> fetched once).
                pl.BlockSpec((batch, dim), lambda i: (0, 0)),
            ],
            out_specs=pl.BlockSpec((tile_m, 1), lambda i: (i, 0)),
        ),
        compiler_params=pltpu.CompilerParams(
            dimension_semantics=("parallel",),
            vmem_limit_bytes=_vmem_limit_bytes(batch, dim, tile_m),
        ),
    )(features, features)

    # Tiny O(B) reduction; keeping it outside lets the row axis stay parallel.
    return jnp.mean(per_row)


def _reference_loss(features, temperature=0.1):
    """Pure-JAX transliteration of the PyTorch forward (same diag-before-mask
    behavior), used only as a correctness check."""
    f = features / jnp.maximum(
        jnp.linalg.norm(features, axis=-1, keepdims=True), 1e-12)
    sim = (f @ f.T) / temperature
    b = f.shape[0]
    exp_sim = jnp.where(jnp.eye(b, dtype=bool), 0.0, jnp.exp(sim))
    pos = jnp.diag(exp_sim)
    neg = exp_sim.sum(axis=1) - pos
    return jnp.mean(-jnp.log(pos / (pos + neg + 1e-8)))


if __name__ == "__main__":
    key = jax.random.PRNGKey(0)
    k_feat, k_lab = jax.random.split(key)

    B, D = 8, 32
    features = jax.random.normal(k_feat, (B, D), dtype=jnp.float32)
    labels = jax.random.randint(k_lab, (B,), 0, 4, dtype=jnp.int32)

    loss = contrastive_loss(features, labels, temperature=0.1)
    loss = jax.block_until_ready(loss)

    ref = _reference_loss(features, temperature=0.1)
    # Reference semantics give +inf (diagonal is zeroed before torch.diag);
    # the kernel must reproduce that exactly.
    same = bool((loss == ref) | (jnp.isnan(loss) & jnp.isnan(ref)))
    assert same, f"kernel={loss} ref={ref}"
    print("KERNEL_OK")
</pallas_src>

<mosaic_0001>
module attributes {stable_mosaic.version = 11 : i64} {
  func.func @_contrastive_loss_kernel(%arg0: i32, %arg1: memref<8x32xf32, #tpu.memory_space<vmem>>, %arg2: memref<8x32xf32, #tpu.memory_space<vmem>>, %arg3: memref<8x1xf32, #tpu.memory_space<vmem>>) attributes {dimension_semantics = [#tpu.dimension_semantics<parallel>], iteration_bounds = array<i64: 1>, scalar_prefetch = 0 : i64, scratch_operands = 0 : i64, tpu.core_type = #tpu.core_type<tc>, window_params = [{transform_indices = @transform_0, window_bounds = array<i64: 8, 32>}, {pipeline_mode = #tpu.pipeline_mode<synchronous>, transform_indices = @transform_1, window_bounds = array<i64: 8, 32>}, {transform_indices = @transform_2, window_bounds = array<i64: 8, 1>}]} {
    %c0 = arith.constant 0 : index
    %c0_0 = arith.constant 0 : index
    %0 = vector.load %arg1[%c0, %c0_0] : memref<8x32xf32, #tpu.memory_space<vmem>>, vector<8x32xf32>
    %c0_1 = arith.constant 0 : index
    %c0_2 = arith.constant 0 : index
    %1 = vector.load %arg2[%c0_1, %c0_2] : memref<8x32xf32, #tpu.memory_space<vmem>>, vector<8x32xf32>
    %2 = arith.mulf %0, %0 : vector<8x32xf32>
    %cst = arith.constant dense<0.000000e+00> : vector<8xf32>
    %3 = vector.multi_reduction <add>, %2, %cst [1] : vector<8x32xf32> to vector<8xf32>
    %4 = vector.shape_cast %3 : vector<8xf32> to vector<8x1xf32>
    %cst_3 = arith.constant 1.000000e-24 : f32
    %5 = vector.broadcast %cst_3 : f32 to vector<8x1xf32>
    %6 = arith.maximumf %4, %5 : vector<8x1xf32>
    %7 = math.rsqrt %6 : vector<8x1xf32>
    %cst_4 = arith.constant 3.1622777 : f32
    %8 = vector.broadcast %cst_4 : f32 to vector<8x1xf32>
    %9 = arith.mulf %7, %8 : vector<8x1xf32>
    %10 = arith.mulf %1, %1 : vector<8x32xf32>
    %cst_5 = arith.constant dense<0.000000e+00> : vector<8xf32>
    %11 = vector.multi_reduction <add>, %10, %cst_5 [1] : vector<8x32xf32> to vector<8xf32>
    %12 = vector.shape_cast %11 : vector<8xf32> to vector<8x1xf32>
    %cst_6 = arith.constant 1.000000e-24 : f32
    %13 = vector.broadcast %cst_6 : f32 to vector<8x1xf32>
    %14 = arith.maximumf %12, %13 : vector<8x1xf32>
    %15 = math.rsqrt %14 : vector<8x1xf32>
    %cst_7 = arith.constant 3.1622777 : f32
    %16 = vector.broadcast %cst_7 : f32 to vector<8x1xf32>
    %17 = arith.mulf %15, %16 : vector<8x1xf32>
    %18 = vector.broadcast %9 : vector<8x1xf32> to vector<8x32xf32>
    %19 = arith.mulf %0, %18 : vector<8x32xf32>
    %20 = vector.broadcast %17 : vector<8x1xf32> to vector<8x32xf32>
    %21 = arith.mulf %1, %20 : vector<8x32xf32>
    %22 = arith.truncf %19 : vector<8x32xf32> to vector<8x32xbf16>
    %23 = arith.truncf %21 : vector<8x32xf32> to vector<8x32xbf16>
    %cst_8 = arith.constant dense<0.000000e+00> : vector<8x8xf32>
    %24 = tpu.matmul %22, %23, %cst_8 {dimension_numbers = #tpu.dot_dimension_numbers<[1], [1], [0], [0], [0, 0, 1, 0], [], []>} : vector<8x32xbf16>, vector<8x32xbf16>, vector<8x8xf32> -> vector<8x8xf32>
    %c8_i32 = arith.constant 8 : i32
    %25 = arith.muli %arg0, %c8_i32 : i32
    %26 = tpu.iota {dimensions = array<i32: 0>} : vector<8x8xi32>
    %27 = vector.broadcast %25 : i32 to vector<8x8xi32>
    %28 = arith.addi %27, %26 : vector<8x8xi32>
    %29 = tpu.iota {dimensions = array<i32: 1>} : vector<8x8xi32>
    %30 = arith.cmpi eq, %28, %29 : vector<8x8xi32>
    %31 = math.exp %24 : vector<8x8xf32>
    %cst_9 = arith.constant 0.000000e+00 : f32
    %32 = vector.broadcast %cst_9 : f32 to vector<8x8xf32>
    %33 = arith.select %30, %32, %31 : vector<8x8xi1>, vector<8x8xf32>
    %cst_10 = arith.constant dense<0.000000e+00> : vector<8xf32>
    %34 = vector.multi_reduction <add>, %33, %cst_10 [1] : vector<8x8xf32> to vector<8xf32>
    %35 = vector.shape_cast %34 : vector<8xf32> to vector<8x1xf32>
    %cst_11 = arith.constant 0.000000e+00 : f32
    %36 = vector.broadcast %cst_11 : f32 to vector<8x1xf32>
    %37 = arith.addf %36, %35 : vector<8x1xf32>
    %cst_12 = arith.constant 9.99999993E-9 : f32
    %38 = vector.broadcast %cst_12 : f32 to vector<8x1xf32>
    %39 = arith.addf %37, %38 : vector<8x1xf32>
    %40 = math.log %39 : vector<8x1xf32>
    %41 = math.log %36 : vector<8x1xf32>
    %42 = arith.subf %40, %41 : vector<8x1xf32>
    %c0_13 = arith.constant 0 : index
    %c0_14 = arith.constant 0 : index
    %43 = vector.load %arg3[%c0_13, %c0_14] : memref<8x1xf32, #tpu.memory_space<vmem>>, vector<8x1xf32>
    tpu.vector_store %arg3[%c0_13, %c0_14], %42 {strides = array<i32>} : memref<8x1xf32, #tpu.memory_space<vmem>>, vector<8x1xf32>,
    return
  }
  func.func @transform_0(%arg0: i32) -> (i32, i32) {
    %c0_i32 = arith.constant 0 : i32
    %c0_i32_0 = arith.constant 0 : i32
    return %arg0, %c0_i32 : i32, i32
  }
  func.func @transform_1(%arg0: i32) -> (i32, i32) {
    %c0_i32 = arith.constant 0 : i32
    %c0_i32_0 = arith.constant 0 : i32
    %c0_i32_1 = arith.constant 0 : i32
    return %c0_i32, %c0_i32_0 : i32, i32
  }
  func.func @transform_2(%arg0: i32) -> (i32, i32) {
    %c0_i32 = arith.constant 0 : i32
    %c0_i32_0 = arith.constant 0 : i32
    return %arg0, %c0_i32 : i32, i32
  }
}

</mosaic_0001>

<bundles_post_ra>
// kernel: tpu_custom_call.1
= control target key start
LH: loop header
LB: loop body
LE: loop exit
PB: predicated region body
PF: predicated region fallthrough
CT: control target
= control target key end

     0   :  { %7 = vsyncpa [#allocation3], 0  ;;  %s220_s0 = inlined_call_operand.hbm [shape: f32[8,32], index: 0, kind: input, shape index: {}]   ;;  %s221_s1 = inlined_call_operand.hbm [shape: f32[8,32], index: 1, kind: input, shape index: {}]   ;;  %s222_s2 = inlined_call_operand.vmem [shape: f32[8,1], index: 2, kind: output, shape index: {}]  }
   0x1   :  { %s14_s11 = sshll.u32 %s220_s0, 4  ;;  %s15_s11 = int_to_ptr.hbm [resolvable:$true] %s14_s11 }
   0x2   :  { %8 = vsyncpa [#allocation5], 0  ;;  %s190_s12 = smov [#allocation2]   ;;  %s25_s16 = sshll.u32 %s221_s1, 4  ;;  %s26_s16 = int_to_ptr.hbm [resolvable:$true] %s25_s16 }
   0x3   :  { %s16_s13 = sshll.u32 %s190_s12, 4  ;;  %s191_s17 = smov [#allocation4]   ;;  %s17_s13 = int_to_ptr.vmem [resolvable:$true] %s16_s13 }
   0x4   :  { %19 = dma.hbm_to_vmem [thread:$0]  %s15_s11, 128, %s17_s13, [#allocation3]  }
   0x5   :  { %s27_s18 = sshll.u32 %s191_s17, 4  ;;  %s28_s18 = int_to_ptr.vmem [resolvable:$true] %s27_s18 }
   0x6   :  { %30 = dma.hbm_to_vmem [thread:$0]  %s26_s16, 128, %s28_s18, [#allocation5]  }
   0x7   :  { %186 = dma.done.wait [#allocation3], 128  }
   0x8   :  { %187 = vsyncadd [#allocation3], 4294967168 }
   0x9   :  { %188 = dma.done.wait [#allocation5], 128  }
   0xa   :  { %189 = vsyncadd [#allocation5], 4294967168  ;;  %v41_v0 = vld [vmem:[#allocation4] sm:$0xff]  ;;  %vm43_vm0 = vcmask 261120   ;;  %v40_v2 = vld [vmem:[#allocation2] sm:$0xff]  ;;  %v99_v31 = vlaneseq  ;;  %vm109_vm8 = vcmask 64512  }
   0xb   :  { %v59_v1 = vmul.f32 %v41_v0, %v41_v0  ;;  %v42_v4 = vmul.f32 %v40_v2, %v40_v2  ;;  %vm118_vm9 = vcmask 7168  }
   0xc   :  { %v100_v34 = vshrl.u32 %v99_v31, 7  ;;  %v104_v35 = vand.u32 127, %v99_v31 }
   0xd   :  { %v60_v3 = vsel %vm43_vm0, %v59_v1, 0.0  ;;  %v44_v5 = vsel %vm43_vm0, %v42_v4, 0.0 }
   0xe   :  { %61 = vadd.xlane.f32.xlu0 %v60_v3  ;;  %vm105_vm7 = vcmp.eq.s32.totalorder %v100_v34, %v104_v35 }
  0x16   :  { %45 = vadd.xlane.f32.xlu0 %v44_v5 }
  0x81   :  { %v62_v6 = vpop.xlane.xlu0 %61 }
  0x82   :  { %v63_v7 = vmax.f32 %v62_v6, 1e-24 }
  0x84   :  { %130 = vrsqrt.f32 %v63_v7  ;;  %vm70_vm2 = vweird.f32 %v63_v7 }
  0x89   :  { %v46_v8 = vpop.xlane.xlu0 %45 }
  0x8a   :  { %v131_v9 = vpop.eup %130  ;;  %v47_v10 = vmax.f32 %v46_v8, 1e-24 }
  0x8b   :  { %v65_v11 = vmul.f32 %v131_v9, %v63_v7  ;;  %vm71_vm1 = vweird.f32 %v131_v9 }
  0x8c   :  { %132 = vrsqrt.f32 %v47_v10  ;;  %vm72_vm3 = vmor %vm70_vm2, %vm71_vm1  ;;  %vm54_vm5 = vweird.f32 %v47_v10 }
  0x8d   :  { %v66_v12 = vmul.f32 %v131_v9, %v65_v11 }
  0x8f   :  { %v67_v13 = vmul.f32 0.5, %v66_v12 }
  0x91   :  { %v68_v14 = vsub.f32 1.5, %v67_v13 }
  0x92   :  { %v133_v15 = vpop.eup %132 }
  0x93   :  { %v49_v16 = vmul.f32 %v133_v15, %v47_v10  ;;  %v69_v17 = vmul.f32 %v131_v9, %v68_v14  ;;  %vm55_vm4 = vweird.f32 %v133_v15 }
  0x94   :  { %vm56_vm6 = vmor %vm54_vm5, %vm55_vm4 }
  0x95   :  { %v50_v18 = vmul.f32 %v133_v15, %v49_v16  ;;  %v73_v19 = vsel %vm72_vm3, %v131_v9, %v69_v17 }
  0x96   :  { %v74_v20 = vmul.f32 3.1622777, %v73_v19 }
  0x97   :  { %v51_v21 = vmul.f32 0.5, %v50_v18 }
  0x98   :  { %v76_v22 = vmul.f32 %v74_v20, %v41_v0 }
  0x99   :  { %v52_v23 = vsub.f32 1.5, %v51_v21 }
  0x9a   :  { %v78_v24 = vpack.c.bf16 %v76_v22, %v76_v22 }
  0x9b   :  { %v53_v25 = vmul.f32 %v133_v15, %v52_v23 }
  0x9c   :  { %v83_v26 = vsel %vm43_vm0, %v78_v24, 0 }
  0x9d   :  { %92 = vmatpush.bf16.xpose.msra.mxu0 %v83_v26  ;;  %v57_v27 = vsel %vm56_vm6, %v133_v15, %v53_v25 }
  0x9e   :  { %v58_v28 = vmul.f32 3.1622777, %v57_v27 }
  0xa0   :  { %v75_v29 = vmul.f32 %v58_v28, %v40_v2 }
  0xa2   :  { %v77_v30 = vpack.c.bf16 %v75_v29, %v75_v29 }
  0xa4   :  { %126 = vmatmul.msk.bf16.vlgmr.msra.gmra.mxu0 %vm43_vm0, %v77_v30 }
 0x121   :  { %v94_v32 = vpop.f32.mrf.mxu0 }
 0x122   :  { %v106_v33 = vmul.f32 1.442695, %v94_v32 }
 0x124   :  { %134 = vpow2.f32 %v106_v33 }
 0x129   :  { %v96_v36 = vpop.f32.mrf.mxu0 }
 0x12a   :  { %v135_v37 = vpop.eup %134 }
 0x12b   :  { %v108_v38 = vsel %vm105_vm7, 0.0, %v135_v37 }
 0x12c   :  { %v110_v39 = vsel %vm109_vm8, %v108_v38, 0.0 }
 0x12d   :  { %111 = vadd.xlane.f32.xlu1 %v110_v39 }
 0x1a0   :  { %v112_v40 = vpop.xlane.xlu1 %111 }
 0x1a1   :  { %v114_v41 = vadd.f32 1e-08, %v112_v40 }
 0x1a3   :  { %136 = vlog2.f32 %v114_v41 }
 0x1a9   :  { %v137_v42 = vpop.eup %136 }
 0x1aa   :  { %v116_v43 = vmul.f32 0.6931472, %v137_v42 }
 0x1ac   :  { %v127_v44 = vadd.f32 inf, %v116_v43 }
 0x1ae   :  { %119 = vst.msk [vmem:[%s222_s2] sm:$0xff] %vm118_vm9, %v127_v44 }
 0x1af   :  { %124 = vsyncpa [#allocation3], 1 }
 0x1b0   :  { %125 = vsyncpa [#allocation5], 1 }

</bundles_post_ra>
